<compile_context>
chip_gen: v6e
topology: v6e:2x2x1
jax: 0.10.0
libtpu: 0.0.40
codegen_flags: <defaults>
</compile_context>

<pallas_src>
import jax
import jax.numpy as jnp
from jax.experimental import pallas as pl
from jax.experimental.pallas import tpu as pltpu

EPS = 1e-5  # torch.nn.LayerNorm default eps


def _conv_relu_norm_fused(xpad_ref, w_ref, b_ref, g_ref, be_ref, bb, t):
    """One ConvReLUNorm layer from a zero-padded time scratch.

    xpad_ref: VMEM ref (bb, t + 2*pad, cin) with zeroed halo rows
    w_ref:    (K*cin, cout) fused conv weight
    b_ref, g_ref, be_ref: (1, cout)
    returns (bb*t, cout) f32
    """
    kc, _ = w_ref.shape
    cin = xpad_ref.shape[-1]
    k = kc // cin

    # Build the fused (bb*t, K*cin) operand: K shifted views concatenated on
    # the lane axis, batch elements stacked on the sublane axis.
    rows = []
    for i in range(bb):
        taps = [xpad_ref[i, j:j + t, :] for j in range(k)]
        rows.append(taps[0] if k == 1 else jnp.concatenate(taps, axis=-1))
    xk = rows[0] if bb == 1 else jnp.concatenate(rows, axis=0)

    acc = jnp.dot(xk, w_ref[...], preferred_element_type=jnp.float32)
    acc = acc + b_ref[...]          # conv bias (single add)
    acc = jnp.maximum(acc, 0.0)     # ReLU

    mean = jnp.mean(acc, axis=-1, keepdims=True)
    var = jnp.mean(acc * acc, axis=-1, keepdims=True) - mean * mean
    h = (acc - mean) * jax.lax.rsqrt(var + EPS)
    return h * g_ref[...] + be_ref[...]   # dropout == identity at inference


def temporal_predictor_kernel(x_ref, mask3_ref, mask2_ref,
                              w0_ref, b0_ref, g0_ref, be0_ref,
                              w1_ref, b1_ref, g1_ref, be1_ref,
                              wfc_ref, bfc_ref,
                              out_ref, xpad0_ref, xpad1_ref):
    bb, t, cin = x_ref.shape
    cf = w0_ref.shape[1]
    k0 = w0_ref.shape[0] // cin
    pad0 = k0 // 2
    k1 = w1_ref.shape[0] // cf
    pad1 = k1 // 2

    # Masked input written into the zero-padded scratch.
    xm = x_ref[...].astype(jnp.float32) * mask3_ref[...].astype(jnp.float32)
    if pad0:
        xpad0_ref[:, 0:pad0, :] = jnp.zeros((bb, pad0, cin), jnp.float32)
        xpad0_ref[:, pad0 + t:pad0 + t + pad0, :] = jnp.zeros(
            (bb, pad0, cin), jnp.float32)
    for i in range(bb):
        xpad0_ref[i, pad0:pad0 + t, :] = xm[i]

    h = _conv_relu_norm_fused(xpad0_ref, w0_ref, b0_ref, g0_ref, be0_ref, bb, t)

    if pad1:
        xpad1_ref[:, 0:pad1, :] = jnp.zeros((bb, pad1, cf), jnp.float32)
        xpad1_ref[:, pad1 + t:pad1 + t + pad1, :] = jnp.zeros(
            (bb, pad1, cf), jnp.float32)
    for i in range(bb):
        xpad1_ref[i, pad1:pad1 + t, :] = h[i * t:(i + 1) * t, :]

    h = _conv_relu_norm_fused(xpad1_ref, w1_ref, b1_ref, g1_ref, be1_ref, bb, t)

    # Final Linear(filter_size, 1): (1, Cf) contracted against (Bb*T, Cf)
    # -> lane-dense (1, Bb*T) row (avoids the N=1 matmul + masked stores).
    y = jax.lax.dot_general(wfc_ref[...], h, (((1,), (1,)), ((), ())),
                            preferred_element_type=jnp.float32)
    y = (y + bfc_ref[...]) * mask2_ref[0]          # (1, Bb*T)
    out_ref[0] = y.astype(out_ref.dtype)


def _full_spec(shape):
    n = len(shape)
    return pl.BlockSpec(shape, lambda i, _n=n: (0,) * _n)


def _default_block_b(batch):
    """Largest divisor of `batch` that still leaves >=2 grid steps (v7x TCs)."""
    if batch <= 1:
        return 1
    bb = batch // 2
    while batch % bb:
        bb -= 1
    return max(bb, 1)


def temporal_predictor(enc_out, enc_out_mask, layer0, layer1, fc, block_b=None):
    """enc_out: (B, T, Cin) f32, enc_out_mask: (B, T, 1) f32 -> (B, T) f32."""
    B, T, Cin = enc_out.shape
    (w0, b0, g0, be0) = layer0
    (w1, b1, g1, be1) = layer1
    (wfc, bfc) = fc
    K, _, Cf = w0.shape
    pad = K // 2

    if block_b is None:
        block_b = _default_block_b(B)
    assert B % block_b == 0, (B, block_b)
    ng = B // block_b

    # Host-side reshapes (free): fuse the K conv taps into one contraction dim,
    # turn the fc weight into a row, and lay the output-side mask lane-dense.
    w0f = w0.reshape(K * Cin, Cf)
    w1f = w1.reshape(K * Cf, Cf)
    wfc_row = wfc.reshape(1, Cf)
    mask3 = enc_out_mask.astype(jnp.float32)                     # (B, T, 1)
    mask2 = enc_out_mask[..., 0].reshape(ng, 1, block_b * T).astype(jnp.float32)

    out = pl.pallas_call(
        temporal_predictor_kernel,
        out_shape=jax.ShapeDtypeStruct((ng, 1, block_b * T), jnp.float32),
        grid_spec=pltpu.PrefetchScalarGridSpec(
            num_scalar_prefetch=0,
            grid=(ng,),
            in_specs=[
                pl.BlockSpec((block_b, T, Cin), lambda i: (i, 0, 0)),
                pl.BlockSpec((block_b, T, 1), lambda i: (i, 0, 0)),
                pl.BlockSpec((1, 1, block_b * T), lambda i: (i, 0, 0)),
                _full_spec(w0f.shape), _full_spec(b0.shape),
                _full_spec(g0.shape), _full_spec(be0.shape),
                _full_spec(w1f.shape), _full_spec(b1.shape),
                _full_spec(g1.shape), _full_spec(be1.shape),
                _full_spec(wfc_row.shape), _full_spec(bfc.shape),
            ],
            out_specs=pl.BlockSpec((1, 1, block_b * T), lambda i: (i, 0, 0)),
            scratch_shapes=[
                pltpu.VMEM((block_b, T + 2 * pad, Cin), jnp.float32),
                pltpu.VMEM((block_b, T + 2 * pad, Cf), jnp.float32),
            ],
        ),
        compiler_params=pltpu.CompilerParams(
            dimension_semantics=("parallel",)),
        # NOTE: for production FastPitch shapes (T ~ 2k, C ~ 256-512) size
        # block_b so 2x double-buffered blocks fit scoped VMEM (64 MiB on v7x)
        # and raise vmem_limit_bytes explicitly.
    )(enc_out, mask3, mask2, w0f, b0, g0, be0, w1f, b1, g1, be1, wfc_row, bfc)
    return out.reshape(B, T)


def ref_forward(enc_out, mask, layers, fc):
    """Pure-JAX reference matching the PyTorch forward semantics."""
    x = enc_out * mask
    for (w, b, g, be) in layers:
        K = w.shape[0]
        pad = K // 2
        T = x.shape[1]
        xp = jnp.pad(x, ((0, 0), (pad, pad), (0, 0)))
        acc = jnp.zeros((x.shape[0], T, w.shape[2]), jnp.float32) + b[None]
        for k in range(K):
            acc = acc + jnp.einsum('btc,cd->btd', xp[:, k:k + T, :], w[k])
        acc = jax.nn.relu(acc)
        mean = acc.mean(-1, keepdims=True)
        var = ((acc - mean) ** 2).mean(-1, keepdims=True)
        x = (acc - mean) / jnp.sqrt(var + EPS) * g[None] + be[None]
    wfc, bfc = fc
    out = jnp.einsum('btc,co->bto', x, wfc) + bfc[None]
    out = out * mask
    return out[..., 0]


if __name__ == "__main__":
    B, T = 4, 16
    input_size, filter_size, kernel_size = 32, 32, 3

    key = jax.random.PRNGKey(0)
    keys = jax.random.split(key, 8)

    enc_out = jax.random.normal(keys[0], (B, T, input_size), jnp.float32)
    lengths = jnp.array([16, 11, 7, 13])
    enc_out_mask = (jnp.arange(T)[None, :] < lengths[:, None]).astype(
        jnp.float32)[..., None]                       # (B, T, 1)

    def make_conv_layer(k, cin, cout):
        kw, kb, kg, kbe = jax.random.split(k, 4)
        w = 0.1 * jax.random.normal(kw, (kernel_size, cin, cout), jnp.float32)
        b = 0.1 * jax.random.normal(kb, (1, cout), jnp.float32)
        g = 1.0 + 0.05 * jax.random.normal(kg, (1, cout), jnp.float32)
        be = 0.05 * jax.random.normal(kbe, (1, cout), jnp.float32)
        return (w, b, g, be)

    layer0 = make_conv_layer(keys[1], input_size, filter_size)
    layer1 = make_conv_layer(keys[2], filter_size, filter_size)
    wfc = 0.1 * jax.random.normal(keys[3], (filter_size, 1), jnp.float32)
    bfc = 0.1 * jax.random.normal(keys[4], (1, 1), jnp.float32)

    out = temporal_predictor(enc_out, enc_out_mask, layer0, layer1, (wfc, bfc))
    out = jax.block_until_ready(out)

    ref = ref_forward(enc_out, enc_out_mask, [layer0, layer1], (wfc, bfc))
    assert out.shape == (B, T), out.shape
    assert jnp.allclose(out, ref, atol=1e-4, rtol=1e-4), (
        "mismatch vs reference", float(jnp.max(jnp.abs(out - ref))))

    print("KERNEL_OK")
</pallas_src>

<mosaic_0001>
module attributes {stable_mosaic.version = 11 : i64} {
  func.func @temporal_predictor_kernel(%arg0: i32, %arg1: memref<2x16x32xf32, #tpu.memory_space<vmem>>, %arg2: memref<2x16x1xf32, #tpu.memory_space<vmem>>, %arg3: memref<1x1x32xf32, #tpu.memory_space<vmem>>, %arg4: memref<96x32xf32, #tpu.memory_space<vmem>>, %arg5: memref<1x32xf32, #tpu.memory_space<vmem>>, %arg6: memref<1x32xf32, #tpu.memory_space<vmem>>, %arg7: memref<1x32xf32, #tpu.memory_space<vmem>>, %arg8: memref<96x32xf32, #tpu.memory_space<vmem>>, %arg9: memref<1x32xf32, #tpu.memory_space<vmem>>, %arg10: memref<1x32xf32, #tpu.memory_space<vmem>>, %arg11: memref<1x32xf32, #tpu.memory_space<vmem>>, %arg12: memref<1x32xf32, #tpu.memory_space<vmem>>, %arg13: memref<1x1xf32, #tpu.memory_space<vmem>>, %arg14: memref<1x1x32xf32, #tpu.memory_space<vmem>>, %arg15: memref<2x18x32xf32, #tpu.memory_space<vmem>>, %arg16: memref<2x18x32xf32, #tpu.memory_space<vmem>>) attributes {dimension_semantics = [#tpu.dimension_semantics<parallel>], iteration_bounds = array<i64: 2>, scalar_prefetch = 0 : i64, scratch_operands = 2 : i64, tpu.core_type = #tpu.core_type<tc>, window_params = [{transform_indices = @transform_0, window_bounds = array<i64: 2, 16, 32>}, {transform_indices = @transform_1, window_bounds = array<i64: 2, 16, 1>}, {transform_indices = @transform_2, window_bounds = array<i64: 1, 1, 32>}, {pipeline_mode = #tpu.pipeline_mode<synchronous>, transform_indices = @transform_3, window_bounds = array<i64: 96, 32>}, {pipeline_mode = #tpu.pipeline_mode<synchronous>, transform_indices = @transform_4, window_bounds = array<i64: 1, 32>}, {pipeline_mode = #tpu.pipeline_mode<synchronous>, transform_indices = @transform_5, window_bounds = array<i64: 1, 32>}, {pipeline_mode = #tpu.pipeline_mode<synchronous>, transform_indices = @transform_6, window_bounds = array<i64: 1, 32>}, {pipeline_mode = #tpu.pipeline_mode<synchronous>, transform_indices = @transform_7, window_bounds = array<i64: 96, 32>}, {pipeline_mode = #tpu.pipeline_mode<synchronous>, transform_indices = @transform_8, window_bounds = array<i64: 1, 32>}, {pipeline_mode = #tpu.pipeline_mode<synchronous>, transform_indices = @transform_9, window_bounds = array<i64: 1, 32>}, {pipeline_mode = #tpu.pipeline_mode<synchronous>, transform_indices = @transform_10, window_bounds = array<i64: 1, 32>}, {pipeline_mode = #tpu.pipeline_mode<synchronous>, transform_indices = @transform_11, window_bounds = array<i64: 1, 32>}, {pipeline_mode = #tpu.pipeline_mode<synchronous>, transform_indices = @transform_12, window_bounds = array<i64: 1, 1>}, {transform_indices = @transform_13, window_bounds = array<i64: 1, 1, 32>}]} {
    %c0 = arith.constant 0 : index
    %c0_0 = arith.constant 0 : index
    %c0_1 = arith.constant 0 : index
    %0 = vector.load %arg1[%c0, %c0_0, %c0_1] : memref<2x16x32xf32, #tpu.memory_space<vmem>>, vector<2x16x32xf32>
    %c0_2 = arith.constant 0 : index
    %c0_3 = arith.constant 0 : index
    %c0_4 = arith.constant 0 : index
    %1 = vector.load %arg2[%c0_2, %c0_3, %c0_4] : memref<2x16x1xf32, #tpu.memory_space<vmem>>, vector<2x16x1xf32>
    %2 = vector.broadcast %1 : vector<2x16x1xf32> to vector<2x16x32xf32>
    %3 = arith.mulf %0, %2 : vector<2x16x32xf32>
    %cst = arith.constant 0.000000e+00 : f32
    %4 = vector.broadcast %cst : f32 to vector<2x1x32xf32>
    %c0_5 = arith.constant 0 : index
    %c0_6 = arith.constant 0 : index
    %c0_7 = arith.constant 0 : index
    %5 = vector.load %arg15[%c0_5, %c0_6, %c0_7] : memref<2x18x32xf32, #tpu.memory_space<vmem>>, vector<2x1x32xf32>
    tpu.vector_store %arg15[%c0_5, %c0_6, %c0_7], %4 {strides = array<i32>} : memref<2x18x32xf32, #tpu.memory_space<vmem>>, vector<2x1x32xf32>,
    %cst_8 = arith.constant 0.000000e+00 : f32
    %6 = vector.broadcast %cst_8 : f32 to vector<2x1x32xf32>
    %c0_9 = arith.constant 0 : index
    %c17 = arith.constant 17 : index
    %c0_10 = arith.constant 0 : index
    %7 = vector.load %arg15[%c0_9, %c17, %c0_10] : memref<2x18x32xf32, #tpu.memory_space<vmem>>, vector<2x1x32xf32>
    tpu.vector_store %arg15[%c0_9, %c17, %c0_10], %6 {strides = array<i32>} : memref<2x18x32xf32, #tpu.memory_space<vmem>>, vector<2x1x32xf32>,
    %8 = vector.extract_strided_slice %3 {offsets = [0, 0, 0], sizes = [1, 16, 32], strides = [1, 1, 1]} : vector<2x16x32xf32> to vector<1x16x32xf32>
    %9 = vector.shape_cast %8 : vector<1x16x32xf32> to vector<16x32xf32>
    %c0_11 = arith.constant 0 : index
    %c1 = arith.constant 1 : index
    %c0_12 = arith.constant 0 : index
    %10 = vector.load %arg15[%c0_11, %c1, %c0_12] : memref<2x18x32xf32, #tpu.memory_space<vmem>>, vector<1x16x32xf32>
    %11 = vector.shape_cast %10 : vector<1x16x32xf32> to vector<16x32xf32>
    %12 = vector.shape_cast %9 : vector<16x32xf32> to vector<1x16x32xf32>
    tpu.vector_store %arg15[%c0_11, %c1, %c0_12], %12 {strides = array<i32>} : memref<2x18x32xf32, #tpu.memory_space<vmem>>, vector<1x16x32xf32>,
    %13 = vector.extract_strided_slice %3 {offsets = [1, 0, 0], sizes = [1, 16, 32], strides = [1, 1, 1]} : vector<2x16x32xf32> to vector<1x16x32xf32>
    %14 = vector.shape_cast %13 : vector<1x16x32xf32> to vector<16x32xf32>
    %c1_13 = arith.constant 1 : index
    %c1_14 = arith.constant 1 : index
    %c0_15 = arith.constant 0 : index
    %15 = vector.load %arg15[%c1_13, %c1_14, %c0_15] : memref<2x18x32xf32, #tpu.memory_space<vmem>>, vector<1x16x32xf32>
    %16 = vector.shape_cast %15 : vector<1x16x32xf32> to vector<16x32xf32>
    %17 = vector.shape_cast %14 : vector<16x32xf32> to vector<1x16x32xf32>
    tpu.vector_store %arg15[%c1_13, %c1_14, %c0_15], %17 {strides = array<i32>} : memref<2x18x32xf32, #tpu.memory_space<vmem>>, vector<1x16x32xf32>,
    %c0_16 = arith.constant 0 : index
    %c0_17 = arith.constant 0 : index
    %c0_18 = arith.constant 0 : index
    %18 = vector.load %arg15[%c0_16, %c0_17, %c0_18] : memref<2x18x32xf32, #tpu.memory_space<vmem>>, vector<1x16x32xf32>
    %19 = vector.shape_cast %18 : vector<1x16x32xf32> to vector<16x32xf32>
    %c0_19 = arith.constant 0 : index
    %c1_20 = arith.constant 1 : index
    %c0_21 = arith.constant 0 : index
    %20 = vector.load %arg15[%c0_19, %c1_20, %c0_21] : memref<2x18x32xf32, #tpu.memory_space<vmem>>, vector<1x16x32xf32>
    %21 = vector.shape_cast %20 : vector<1x16x32xf32> to vector<16x32xf32>
    %c0_22 = arith.constant 0 : index
    %c2 = arith.constant 2 : index
    %c0_23 = arith.constant 0 : index
    %22 = vector.load %arg15[%c0_22, %c2, %c0_23] : memref<2x18x32xf32, #tpu.memory_space<vmem>>, vector<1x16x32xf32>
    %23 = vector.shape_cast %22 : vector<1x16x32xf32> to vector<16x32xf32>
    %24 = tpu.concatenate %19, %21, %23 in 1 : vector<16x32xf32>, vector<16x32xf32>, vector<16x32xf32> -> vector<16x96xf32>
    %c1_24 = arith.constant 1 : index
    %c0_25 = arith.constant 0 : index
    %c0_26 = arith.constant 0 : index
    %25 = vector.load %arg15[%c1_24, %c0_25, %c0_26] : memref<2x18x32xf32, #tpu.memory_space<vmem>>, vector<1x16x32xf32>
    %26 = vector.shape_cast %25 : vector<1x16x32xf32> to vector<16x32xf32>
    %c1_27 = arith.constant 1 : index
    %c1_28 = arith.constant 1 : index
    %c0_29 = arith.constant 0 : index
    %27 = vector.load %arg15[%c1_27, %c1_28, %c0_29] : memref<2x18x32xf32, #tpu.memory_space<vmem>>, vector<1x16x32xf32>
    %28 = vector.shape_cast %27 : vector<1x16x32xf32> to vector<16x32xf32>
    %c1_30 = arith.constant 1 : index
    %c2_31 = arith.constant 2 : index
    %c0_32 = arith.constant 0 : index
    %29 = vector.load %arg15[%c1_30, %c2_31, %c0_32] : memref<2x18x32xf32, #tpu.memory_space<vmem>>, vector<1x16x32xf32>
    %30 = vector.shape_cast %29 : vector<1x16x32xf32> to vector<16x32xf32>
    %31 = tpu.concatenate %26, %28, %30 in 1 : vector<16x32xf32>, vector<16x32xf32>, vector<16x32xf32> -> vector<16x96xf32>
    %32 = tpu.concatenate %24, %31 in 0 : vector<16x96xf32>, vector<16x96xf32> -> vector<32x96xf32>
    %c0_33 = arith.constant 0 : index
    %c0_34 = arith.constant 0 : index
    %33 = vector.load %arg4[%c0_33, %c0_34] : memref<96x32xf32, #tpu.memory_space<vmem>>, vector<96x32xf32>
    %cst_35 = arith.constant dense<0.000000e+00> : vector<32x32xf32>
    %34 = tpu.matmul %32, %33, %cst_35 {dimension_numbers = #tpu.dot_dimension_numbers<[1], [0], [0], [1], [0, 0, 1, 1], [], []>} : vector<32x96xf32>, vector<96x32xf32>, vector<32x32xf32> -> vector<32x32xf32>
    %c0_36 = arith.constant 0 : index
    %c0_37 = arith.constant 0 : index
    %35 = vector.load %arg5[%c0_36, %c0_37] : memref<1x32xf32, #tpu.memory_space<vmem>>, vector<1x32xf32>
    %36 = vector.broadcast %35 : vector<1x32xf32> to vector<32x32xf32>
    %37 = arith.addf %34, %36 : vector<32x32xf32>
    %cst_38 = arith.constant 0.000000e+00 : f32
    %38 = vector.broadcast %cst_38 : f32 to vector<32x32xf32>
    %39 = arith.maximumf %37, %38 : vector<32x32xf32>
    %cst_39 = arith.constant dense<0.000000e+00> : vector<32xf32>
    %40 = vector.multi_reduction <add>, %39, %cst_39 [1] : vector<32x32xf32> to vector<32xf32>
    %41 = vector.shape_cast %40 : vector<32xf32> to vector<32x1xf32>
    %cst_40 = arith.constant 3.200000e+01 : f32
    %42 = vector.broadcast %cst_40 : f32 to vector<32x1xf32>
    %43 = arith.divf %41, %42 : vector<32x1xf32>
    %44 = arith.mulf %39, %39 : vector<32x32xf32>
    %cst_41 = arith.constant dense<0.000000e+00> : vector<32xf32>
    %45 = vector.multi_reduction <add>, %44, %cst_41 [1] : vector<32x32xf32> to vector<32xf32>
    %46 = vector.shape_cast %45 : vector<32xf32> to vector<32x1xf32>
    %cst_42 = arith.constant 3.200000e+01 : f32
    %47 = vector.broadcast %cst_42 : f32 to vector<32x1xf32>
    %48 = arith.divf %46, %47 : vector<32x1xf32>
    %49 = arith.mulf %43, %43 : vector<32x1xf32>
    %50 = arith.subf %48, %49 : vector<32x1xf32>
    %51 = vector.broadcast %43 : vector<32x1xf32> to vector<32x32xf32>
    %52 = arith.subf %39, %51 : vector<32x32xf32>
    %cst_43 = arith.constant 9.99999974E-6 : f32
    %53 = vector.broadcast %cst_43 : f32 to vector<32x1xf32>
    %54 = arith.addf %50, %53 : vector<32x1xf32>
    %55 = math.rsqrt %54 : vector<32x1xf32>
    %56 = vector.broadcast %55 : vector<32x1xf32> to vector<32x32xf32>
    %57 = arith.mulf %52, %56 : vector<32x32xf32>
    %c0_44 = arith.constant 0 : index
    %c0_45 = arith.constant 0 : index
    %58 = vector.load %arg6[%c0_44, %c0_45] : memref<1x32xf32, #tpu.memory_space<vmem>>, vector<1x32xf32>
    %59 = vector.broadcast %58 : vector<1x32xf32> to vector<32x32xf32>
    %60 = arith.mulf %57, %59 : vector<32x32xf32>
    %c0_46 = arith.constant 0 : index
    %c0_47 = arith.constant 0 : index
    %61 = vector.load %arg7[%c0_46, %c0_47] : memref<1x32xf32, #tpu.memory_space<vmem>>, vector<1x32xf32>
    %62 = vector.broadcast %61 : vector<1x32xf32> to vector<32x32xf32>
    %63 = arith.addf %60, %62 : vector<32x32xf32>
    %cst_48 = arith.constant 0.000000e+00 : f32
    %64 = vector.broadcast %cst_48 : f32 to vector<2x1x32xf32>
    %c0_49 = arith.constant 0 : index
    %c0_50 = arith.constant 0 : index
    %c0_51 = arith.constant 0 : index
    %65 = vector.load %arg16[%c0_49, %c0_50, %c0_51] : memref<2x18x32xf32, #tpu.memory_space<vmem>>, vector<2x1x32xf32>
    tpu.vector_store %arg16[%c0_49, %c0_50, %c0_51], %64 {strides = array<i32>} : memref<2x18x32xf32, #tpu.memory_space<vmem>>, vector<2x1x32xf32>,
    %cst_52 = arith.constant 0.000000e+00 : f32
    %66 = vector.broadcast %cst_52 : f32 to vector<2x1x32xf32>
    %c0_53 = arith.constant 0 : index
    %c17_54 = arith.constant 17 : index
    %c0_55 = arith.constant 0 : index
    %67 = vector.load %arg16[%c0_53, %c17_54, %c0_55] : memref<2x18x32xf32, #tpu.memory_space<vmem>>, vector<2x1x32xf32>
    tpu.vector_store %arg16[%c0_53, %c17_54, %c0_55], %66 {strides = array<i32>} : memref<2x18x32xf32, #tpu.memory_space<vmem>>, vector<2x1x32xf32>,
    %68 = vector.extract_strided_slice %63 {offsets = [0, 0], sizes = [16, 32], strides = [1, 1]} : vector<32x32xf32> to vector<16x32xf32>
    %c0_56 = arith.constant 0 : index
    %c1_57 = arith.constant 1 : index
    %c0_58 = arith.constant 0 : index
    %69 = vector.load %arg16[%c0_56, %c1_57, %c0_58] : memref<2x18x32xf32, #tpu.memory_space<vmem>>, vector<1x16x32xf32>
    %70 = vector.shape_cast %69 : vector<1x16x32xf32> to vector<16x32xf32>
    %71 = vector.shape_cast %68 : vector<16x32xf32> to vector<1x16x32xf32>
    tpu.vector_store %arg16[%c0_56, %c1_57, %c0_58], %71 {strides = array<i32>} : memref<2x18x32xf32, #tpu.memory_space<vmem>>, vector<1x16x32xf32>,
    %72 = vector.extract_strided_slice %63 {offsets = [16, 0], sizes = [16, 32], strides = [1, 1]} : vector<32x32xf32> to vector<16x32xf32>
    %c1_59 = arith.constant 1 : index
    %c1_60 = arith.constant 1 : index
    %c0_61 = arith.constant 0 : index
    %73 = vector.load %arg16[%c1_59, %c1_60, %c0_61] : memref<2x18x32xf32, #tpu.memory_space<vmem>>, vector<1x16x32xf32>
    %74 = vector.shape_cast %73 : vector<1x16x32xf32> to vector<16x32xf32>
    %75 = vector.shape_cast %72 : vector<16x32xf32> to vector<1x16x32xf32>
    tpu.vector_store %arg16[%c1_59, %c1_60, %c0_61], %75 {strides = array<i32>} : memref<2x18x32xf32, #tpu.memory_space<vmem>>, vector<1x16x32xf32>,
    %c0_62 = arith.constant 0 : index
    %c0_63 = arith.constant 0 : index
    %c0_64 = arith.constant 0 : index
    %76 = vector.load %arg16[%c0_62, %c0_63, %c0_64] : memref<2x18x32xf32, #tpu.memory_space<vmem>>, vector<1x16x32xf32>
    %77 = vector.shape_cast %76 : vector<1x16x32xf32> to vector<16x32xf32>
    %c0_65 = arith.constant 0 : index
    %c1_66 = arith.constant 1 : index
    %c0_67 = arith.constant 0 : index
    %78 = vector.load %arg16[%c0_65, %c1_66, %c0_67] : memref<2x18x32xf32, #tpu.memory_space<vmem>>, vector<1x16x32xf32>
    %79 = vector.shape_cast %78 : vector<1x16x32xf32> to vector<16x32xf32>
    %c0_68 = arith.constant 0 : index
    %c2_69 = arith.constant 2 : index
    %c0_70 = arith.constant 0 : index
    %80 = vector.load %arg16[%c0_68, %c2_69, %c0_70] : memref<2x18x32xf32, #tpu.memory_space<vmem>>, vector<1x16x32xf32>
    %81 = vector.shape_cast %80 : vector<1x16x32xf32> to vector<16x32xf32>
    %82 = tpu.concatenate %77, %79, %81 in 1 : vector<16x32xf32>, vector<16x32xf32>, vector<16x32xf32> -> vector<16x96xf32>
    %c1_71 = arith.constant 1 : index
    %c0_72 = arith.constant 0 : index
    %c0_73 = arith.constant 0 : index
    %83 = vector.load %arg16[%c1_71, %c0_72, %c0_73] : memref<2x18x32xf32, #tpu.memory_space<vmem>>, vector<1x16x32xf32>
    %84 = vector.shape_cast %83 : vector<1x16x32xf32> to vector<16x32xf32>
    %c1_74 = arith.constant 1 : index
    %c1_75 = arith.constant 1 : index
    %c0_76 = arith.constant 0 : index
    %85 = vector.load %arg16[%c1_74, %c1_75, %c0_76] : memref<2x18x32xf32, #tpu.memory_space<vmem>>, vector<1x16x32xf32>
    %86 = vector.shape_cast %85 : vector<1x16x32xf32> to vector<16x32xf32>
    %c1_77 = arith.constant 1 : index
    %c2_78 = arith.constant 2 : index
    %c0_79 = arith.constant 0 : index
    %87 = vector.load %arg16[%c1_77, %c2_78, %c0_79] : memref<2x18x32xf32, #tpu.memory_space<vmem>>, vector<1x16x32xf32>
    %88 = vector.shape_cast %87 : vector<1x16x32xf32> to vector<16x32xf32>
    %89 = tpu.concatenate %84, %86, %88 in 1 : vector<16x32xf32>, vector<16x32xf32>, vector<16x32xf32> -> vector<16x96xf32>
    %90 = tpu.concatenate %82, %89 in 0 : vector<16x96xf32>, vector<16x96xf32> -> vector<32x96xf32>
    %c0_80 = arith.constant 0 : index
    %c0_81 = arith.constant 0 : index
    %91 = vector.load %arg8[%c0_80, %c0_81] : memref<96x32xf32, #tpu.memory_space<vmem>>, vector<96x32xf32>
    %cst_82 = arith.constant dense<0.000000e+00> : vector<32x32xf32>
    %92 = tpu.matmul %90, %91, %cst_82 {dimension_numbers = #tpu.dot_dimension_numbers<[1], [0], [0], [1], [0, 0, 1, 1], [], []>} : vector<32x96xf32>, vector<96x32xf32>, vector<32x32xf32> -> vector<32x32xf32>
    %c0_83 = arith.constant 0 : index
    %c0_84 = arith.constant 0 : index
    %93 = vector.load %arg9[%c0_83, %c0_84] : memref<1x32xf32, #tpu.memory_space<vmem>>, vector<1x32xf32>
    %94 = vector.broadcast %93 : vector<1x32xf32> to vector<32x32xf32>
    %95 = arith.addf %92, %94 : vector<32x32xf32>
    %cst_85 = arith.constant 0.000000e+00 : f32
    %96 = vector.broadcast %cst_85 : f32 to vector<32x32xf32>
    %97 = arith.maximumf %95, %96 : vector<32x32xf32>
    %cst_86 = arith.constant dense<0.000000e+00> : vector<32xf32>
    %98 = vector.multi_reduction <add>, %97, %cst_86 [1] : vector<32x32xf32> to vector<32xf32>
    %99 = vector.shape_cast %98 : vector<32xf32> to vector<32x1xf32>
    %cst_87 = arith.constant 3.200000e+01 : f32
    %100 = vector.broadcast %cst_87 : f32 to vector<32x1xf32>
    %101 = arith.divf %99, %100 : vector<32x1xf32>
    %102 = arith.mulf %97, %97 : vector<32x32xf32>
    %cst_88 = arith.constant dense<0.000000e+00> : vector<32xf32>
    %103 = vector.multi_reduction <add>, %102, %cst_88 [1] : vector<32x32xf32> to vector<32xf32>
    %104 = vector.shape_cast %103 : vector<32xf32> to vector<32x1xf32>
    %cst_89 = arith.constant 3.200000e+01 : f32
    %105 = vector.broadcast %cst_89 : f32 to vector<32x1xf32>
    %106 = arith.divf %104, %105 : vector<32x1xf32>
    %107 = arith.mulf %101, %101 : vector<32x1xf32>
    %108 = arith.subf %106, %107 : vector<32x1xf32>
    %109 = vector.broadcast %101 : vector<32x1xf32> to vector<32x32xf32>
    %110 = arith.subf %97, %109 : vector<32x32xf32>
    %cst_90 = arith.constant 9.99999974E-6 : f32
    %111 = vector.broadcast %cst_90 : f32 to vector<32x1xf32>
    %112 = arith.addf %108, %111 : vector<32x1xf32>
    %113 = math.rsqrt %112 : vector<32x1xf32>
    %114 = vector.broadcast %113 : vector<32x1xf32> to vector<32x32xf32>
    %115 = arith.mulf %110, %114 : vector<32x32xf32>
    %c0_91 = arith.constant 0 : index
    %c0_92 = arith.constant 0 : index
    %116 = vector.load %arg10[%c0_91, %c0_92] : memref<1x32xf32, #tpu.memory_space<vmem>>, vector<1x32xf32>
    %117 = vector.broadcast %116 : vector<1x32xf32> to vector<32x32xf32>
    %118 = arith.mulf %115, %117 : vector<32x32xf32>
    %c0_93 = arith.constant 0 : index
    %c0_94 = arith.constant 0 : index
    %119 = vector.load %arg11[%c0_93, %c0_94] : memref<1x32xf32, #tpu.memory_space<vmem>>, vector<1x32xf32>
    %120 = vector.broadcast %119 : vector<1x32xf32> to vector<32x32xf32>
    %121 = arith.addf %118, %120 : vector<32x32xf32>
    %c0_95 = arith.constant 0 : index
    %c0_96 = arith.constant 0 : index
    %122 = vector.load %arg12[%c0_95, %c0_96] : memref<1x32xf32, #tpu.memory_space<vmem>>, vector<1x32xf32>
    %cst_97 = arith.constant dense<0.000000e+00> : vector<1x32xf32>
    %123 = tpu.matmul %122, %121, %cst_97 {dimension_numbers = #tpu.dot_dimension_numbers<[1], [1], [0], [0], [0, 0, 1, 0], [], []>} : vector<1x32xf32>, vector<32x32xf32>, vector<1x32xf32> -> vector<1x32xf32>
    %c0_98 = arith.constant 0 : index
    %c0_99 = arith.constant 0 : index
    %124 = vector.load %arg13[%c0_98, %c0_99] : memref<1x1xf32, #tpu.memory_space<vmem>>, vector<1x1xf32>
    %125 = vector.broadcast %124 : vector<1x1xf32> to vector<1x32xf32>
    %126 = arith.addf %123, %125 : vector<1x32xf32>
    %c0_100 = arith.constant 0 : index
    %c0_101 = arith.constant 0 : index
    %c0_102 = arith.constant 0 : index
    %127 = vector.load %arg3[%c0_100, %c0_101, %c0_102] : memref<1x1x32xf32, #tpu.memory_space<vmem>>, vector<1x1x32xf32>
    %128 = vector.shape_cast %127 : vector<1x1x32xf32> to vector<1x32xf32>
    %129 = arith.mulf %126, %128 : vector<1x32xf32>
    %c0_103 = arith.constant 0 : index
    %c0_104 = arith.constant 0 : index
    %c0_105 = arith.constant 0 : index
    %130 = vector.load %arg14[%c0_103, %c0_104, %c0_105] : memref<1x1x32xf32, #tpu.memory_space<vmem>>, vector<1x1x32xf32>
    %131 = vector.shape_cast %130 : vector<1x1x32xf32> to vector<1x32xf32>
    %132 = vector.shape_cast %129 : vector<1x32xf32> to vector<1x1x32xf32>
    tpu.vector_store %arg14[%c0_103, %c0_104, %c0_105], %132 {strides = array<i32>} : memref<1x1x32xf32, #tpu.memory_space<vmem>>, vector<1x1x32xf32>,
    return
  }
  func.func @transform_0(%arg0: i32) -> (i32, i32, i32) {
    %c0_i32 = arith.constant 0 : i32
    %c0_i32_0 = arith.constant 0 : i32
    %c0_i32_1 = arith.constant 0 : i32
    return %arg0, %c0_i32, %c0_i32_0 : i32, i32, i32
  }
  func.func @transform_1(%arg0: i32) -> (i32, i32, i32) {
    %c0_i32 = arith.constant 0 : i32
    %c0_i32_0 = arith.constant 0 : i32
    %c0_i32_1 = arith.constant 0 : i32
    return %arg0, %c0_i32, %c0_i32_0 : i32, i32, i32
  }
  func.func @transform_2(%arg0: i32) -> (i32, i32, i32) {
    %c0_i32 = arith.constant 0 : i32
    %c0_i32_0 = arith.constant 0 : i32
    %c0_i32_1 = arith.constant 0 : i32
    return %arg0, %c0_i32, %c0_i32_0 : i32, i32, i32
  }
  func.func @transform_3(%arg0: i32) -> (i32, i32) {
    %c0_i32 = arith.constant 0 : i32
    %c0_i32_0 = arith.constant 0 : i32
    %c0_i32_1 = arith.constant 0 : i32
    return %c0_i32, %c0_i32_0 : i32, i32
  }
  func.func @transform_4(%arg0: i32) -> (i32, i32) {
    %c0_i32 = arith.constant 0 : i32
    %c0_i32_0 = arith.constant 0 : i32
    %c0_i32_1 = arith.constant 0 : i32
    return %c0_i32, %c0_i32_0 : i32, i32
  }
  func.func @transform_5(%arg0: i32) -> (i32, i32) {
    %c0_i32 = arith.constant 0 : i32
    %c0_i32_0 = arith.constant 0 : i32
    %c0_i32_1 = arith.constant 0 : i32
    return %c0_i32, %c0_i32_0 : i32, i32
  }
  func.func @transform_6(%arg0: i32) -> (i32, i32) {
    %c0_i32 = arith.constant 0 : i32
    %c0_i32_0 = arith.constant 0 : i32
    %c0_i32_1 = arith.constant 0 : i32
    return %c0_i32, %c0_i32_0 : i32, i32
  }
  func.func @transform_7(%arg0: i32) -> (i32, i32) {
    %c0_i32 = arith.constant 0 : i32
    %c0_i32_0 = arith.constant 0 : i32
    %c0_i32_1 = arith.constant 0 : i32
    return %c0_i32, %c0_i32_0 : i32, i32
  }
  func.func @transform_8(%arg0: i32) -> (i32, i32) {
    %c0_i32 = arith.constant 0 : i32
    %c0_i32_0 = arith.constant 0 : i32
    %c0_i32_1 = arith.constant 0 : i32
    return %c0_i32, %c0_i32_0 : i32, i32
  }
  func.func @transform_9(%arg0: i32) -> (i32, i32) {
    %c0_i32 = arith.constant 0 : i32
    %c0_i32_0 = arith.constant 0 : i32
    %c0_i32_1 = arith.constant 0 : i32
    return %c0_i32, %c0_i32_0 : i32, i32
  }
  func.func @transform_10(%arg0: i32) -> (i32, i32) {
    %c0_i32 = arith.constant 0 : i32
    %c0_i32_0 = arith.constant 0 : i32
    %c0_i32_1 = arith.constant 0 : i32
    return %c0_i32, %c0_i32_0 : i32, i32
  }
  func.func @transform_11(%arg0: i32) -> (i32, i32) {
    %c0_i32 = arith.constant 0 : i32
    %c0_i32_0 = arith.constant 0 : i32
    %c0_i32_1 = arith.constant 0 : i32
    return %c0_i32, %c0_i32_0 : i32, i32
  }
  func.func @transform_12(%arg0: i32) -> (i32, i32) {
    %c0_i32 = arith.constant 0 : i32
    %c0_i32_0 = arith.constant 0 : i32
    %c0_i32_1 = arith.constant 0 : i32
    return %c0_i32, %c0_i32_0 : i32, i32
  }
  func.func @transform_13(%arg0: i32) -> (i32, i32, i32) {
    %c0_i32 = arith.constant 0 : i32
    %c0_i32_0 = arith.constant 0 : i32
    %c0_i32_1 = arith.constant 0 : i32
    return %arg0, %c0_i32, %c0_i32_0 : i32, i32, i32
  }
}

</mosaic_0001>

<bundles_post_ra>
// kernel: tpu_custom_call.1
= control target key start
LH: loop header
LB: loop body
LE: loop exit
PB: predicated region body
PF: predicated region fallthrough
CT: control target
= control target key end

     0   :  { %s1913_s0 = inlined_call_operand.vmem [shape: f32[4,16,32], index: 0, kind: input, shape index: {}]   ;;  %s1914_s1 = inlined_call_operand.vmem [shape: f32[4,16,1], index: 1, kind: input, shape index: {}]   ;;  %s1915_s2 = inlined_call_operand.vmem [shape: f32[2,1,32], index: 2, kind: input, shape index: {}]   ;;  %s1916_s3 = inlined_call_operand.vmem [shape: f32[96,32], index: 3, kind: input, shape index: {}]   ;;  %s1917_s4 = inlined_call_operand.vmem [shape: f32[1,32], index: 4, kind: input, shape index: {}]   ;;  %s1918_s5 = inlined_call_operand.vmem [shape: f32[1,32], index: 5, kind: input, shape index: {}]   ;;  %s1919_s6 = inlined_call_operand.vmem [shape: f32[1,32], index: 6, kind: input, shape index: {}]   ;;  %s1920_s7 = inlined_call_operand.vmem [shape: f32[96,32], index: 7, kind: input, shape index: {}]   ;;  %s1921_s8 = inlined_call_operand.vmem [shape: f32[1,32], index: 8, kind: input, shape index: {}]   ;;  %s1922_s9 = inlined_call_operand.vmem [shape: f32[1,32], index: 9, kind: input, shape index: {}]   ;;  %s1923_s10 = inlined_call_operand.vmem [shape: f32[1,32], index: 10, kind: input, shape index: {}]   ;;  %s1924_s11 = inlined_call_operand.vmem [shape: f32[1,32], index: 11, kind: input, shape index: {}]   ;;  %s1925_s12 = inlined_call_operand.<no memory space> [shape: f32[1,1], index: 12, kind: input, shape index: {}]   ;;  %s1926_s13 = inlined_call_operand.hbm [shape: f32[2,1,32], index: 13, kind: output, shape index: {}]  }
   0x1   :  { %1928 = sst [smem:[#allocation9_spill]] %s1913_s0  ;;  %v18_v0 = vstv %s1925_s12 }
   0x2   :  { %1929 = sst [smem:[#allocation10_spill]] %s1914_s1  ;;  %19 = vst [vmem:[#allocation4] sm:$0x1] %v18_v0 }
   0x3   :  { %20 = vsyncpa [#allocation6], 0 }
   0x4   :  { %22 = vsyncpa [#allocation6 + $0x1], 0  ;;  %s1580_s27 = smov 0   ;;  %s1582_s28 = smov 0  }
   0x5   :  { %s1584_s29 = smov 0   ;;  %s1586_s30 = smov 0  }
   0x6 LB: > { %s1601_s12 = sadd.s32 4294967295, %s1499_s30   ;;  %s1235_s14 = sadd.s32 4294967294, %s1499_s30   ;;  %s1499_s30 = sphi %s1586_s30, %s1940_s30   ;;  %s1495_s29 = sphi %s1584_s29, %s1939_s29   ;;  %s1491_s28 = sphi %s1582_s28, %s1938_s28   ;;  %s1487_s27 = sphi %s1580_s27, %s1937_s27  }
   0x7   : > { %s1605_s15 = sadd.s32 1, %s1499_s30   ;;  %s323_s16 = sadd.s32 1, %s1495_s29 }
   0x8   : > { %s320_s17 = ssub.s32 %s1499_s30, %s1605_s15  ;;  %p333_p0 = scmp.ne.s32.totalorder %s1495_s29, %s1491_s28 }
   0x9   : > { %p321_p1 = scmp.eq.s32.totalorder %s320_s17, 0  ;;  %p334_p2 = scmp.eq.s32.totalorder %s1601_s12, 1 }
   0xa   : > { %p339_p3 = scmp.ne.s32.totalorder %s1491_s28, %s1487_s27  ;;  %p340_p4 = scmp.eq.s32.totalorder %s1235_s14, 1 }
   0xb   : > { %s1616_s18 = scalar_select %p321_p1, %s1495_s29, %s323_s16  }
   0xc   : > { %p1618_p5 = por %p334_p2, %p333_p0  ;;  %p1622_p6 = por %p340_p4, %p339_p3 }
   0xd   : > { %1930 = sst [smem:[#allocation8_spill]] %s1616_s18  ;;  %p1238_p7 = scmp.ge.s32.totalorder %s1499_s30, 1 }
   0xe   : > { %p414_p8 = scmp.lt.s32.totalorder %s1499_s30, 3 }
  0x10   : > { %p415_p9 = pnand %p1238_p7, %p414_p8 }
  0x11   : > { %s1239_s21 = sshll.u32 (!%p415_p9), %s1601_s12, 1  ;;  %s1933_s1 = sld [smem:[#allocation10_spill]] (!%p415_p9) }
  0x12   : > { %418 = sbr.rel (%p415_p9) target bundleno = 1385 (0x569), region = 72  ;;  %p468_p10 = scmp.lt.s32.totalorder (!%p415_p9), %s1239_s21, 3 }
  0x13   : > { %s1935_s0 = sld [smem:[#allocation9_spill]] (!%p415_p9)  ;;  %p481_p11 = scmp.lt.s32.totalorder (!%p415_p9), %s1601_s12, 1 }
  0x14   : > { %s465_s16 = sand.u32 (!%p415_p9), 1, %s1491_s28   ;;  %s1264_s23 = sshll.u32 (!%p415_p9), %s1601_s12, 4 }
  0x15   : > { %s466_s24 = scalar_lea.vmem (!%p415_p9), [#allocation5], %s465_s16  ;;  %s1157_s18 = scalar_lea.hbm (!%p415_p9), %s1926_s13, %s1264_s23 }
  0x17   : > { %v1501_v1 = vmov 0   ;;  %s1942_s21 = smov (!%p468_p10, %s1239_s21), 3  ;;  %vm516_vm0 = vcmask 253952   ;;  %v1502_v2 = vmov 0.0   ;;  %v591_v7 = vld [vmem:[%s1916_s3 + $0x58] sm:$0xff]  ;;  %v590_v8 = vld [vmem:[%s1916_s3 + $0x50] sm:$0xff] }
  0x18   : > { %1421 = vset.pattern.permute.xlu0 %v1501_v1  ;;  %1422 = vset.pattern.permute.xlu1 %v1501_v1  ;;  %s1927_s22 = sshll.u32 %s1942_s21, 4  ;;  %519 = vst.msk [vmem:[#allocation2 + $0x11] sm:$0x1] %vm516_vm0, %v1502_v2  ;;  %517 = vst.msk [vmem:[#allocation2] sm:$0x1] %vm516_vm0, %v1502_v2  ;;  %v589_v9 = vld [vmem:[%s1916_s3 + $0x48] sm:$0xff] }
  0x19   : > { %s479_s25 = scalar_lea.vmem %s1933_s1, %s1927_s22  ;;  %518 = vst.msk [vmem:[#allocation2 + $0x18] sm:$0x1] %vm516_vm0, %v1502_v2  ;;  %520 = vst.msk [vmem:[#allocation2 + $0x29] sm:$0x1] %vm516_vm0, %v1502_v2  ;;  %1306 = vmatprep.subr.mxu0 %v591_v7  ;;  %v588_v10 = vld [vmem:[%s1916_s3 + $0x40] sm:$0xff]  ;;  %v587_v11 = vld [vmem:[%s1916_s3 + $0x38] sm:$0xff] }
  0x1a   : > { %784 = vst.msk [vmem:[#allocation3] sm:$0x1] %vm516_vm0, %v1502_v2  ;;  %785 = vst.msk [vmem:[#allocation3 + $0x18] sm:$0x1] %vm516_vm0, %v1502_v2  ;;  %v488_v3 = vld [vmem:[%s479_s25] sm:$0xff]  ;;  %v490_v4 = vld [vmem:[%s479_s25 + $0x10] sm:$0xff]  ;;  %1307 = vmatpush3.msra.mxu0 %v591_v7 }
  0x1b   : > { %786 = vst.msk [vmem:[#allocation3 + $0x11] sm:$0x1] %vm516_vm0, %v1502_v2  ;;  %787 = vst.msk [vmem:[#allocation3 + $0x29] sm:$0x1] %vm516_vm0, %v1502_v2  ;;  %494 = vperm.xlu0 %1421, %v488_v3   ;;  %504 = vperm.xlu1 %1422, %v490_v4   ;;  %v489_v5 = vld [vmem:[%s479_s25 + $0x8] sm:$0xff]  ;;  %v491_v6 = vld [vmem:[%s479_s25 + $0x18] sm:$0xff] }
  0x1c   : > { %1308 = vmatprep.subr.mxu0 %v590_v8  ;;  %v586_v12 = vld [vmem:[%s1916_s3 + $0x30] sm:$0xff]  ;;  %v585_v13 = vld [vmem:[%s1916_s3 + $0x28] sm:$0xff]  ;;  %v584_v14 = vld [vmem:[%s1916_s3 + $0x20] sm:$0xff]  ;;  %s1934_s26 = sshll.u32 %s1942_s21, 4  ;;  %vm521_vm1 = vcmask 261120   ;;  %s1503_s25 = smov 32  }
  0x1d   : > { %1309 = vmatpush3.msra.mxu0 %v590_v8  ;;  %s472_s17 = scalar_lea.vmem %s1935_s0, %s1934_s26  ;;  %v583_v17 = vld [vmem:[%s1916_s3 + $0x18] sm:$0xff]  ;;  %v582_v18 = vld [vmem:[%s1916_s3 + $0x10] sm:$0xff]  ;;  %v581_v25 = vld [vmem:[%s1916_s3 + $0x8] sm:$0xff]  ;;  %s1504_s26 = smov 64   ;;  %vm551_vm2 = vcmask 523264   ;;  %vm599_vm3 = vcmask 785408  }
  0x1e   : > { %1310 = vmatprep.subr.mxu0 %v589_v9  ;;  %v484_v15 = vld [vmem:[%s472_s17] sm:$0xff]  ;;  %v486_v16 = vld [vmem:[%s472_s17 + $0x10] sm:$0xff]  ;;  %v485_v23 = vld [vmem:[%s472_s17 + $0x8] sm:$0xff]  ;;  %vm1505_vm4 = vmmov 0   ;;  %s482_s14 = scalar_select %p481_p11, %s1601_s12, 1 }
  0x1f   : > { %499 = vperm.xlu0 %1421, %v489_v5   ;;  %509 = vperm.xlu1 %1422, %v491_v6   ;;  %v487_v24 = vld [vmem:[%s472_s17 + $0x18] sm:$0xff]  ;;  %v580_v26 = vld [vmem:[%s1916_s3] sm:$0xff]  ;;  %s1159_s21 = sshll.u32 %s466_s24, 4  ;;  %s1147_s0 = scalar_lea.sflag [#allocation6], %s465_s16  ;;  %s1160_s21 = int_to_ptr.vmem [resolvable:$true] %s1159_s21 }
  0x20   : > { %1311 = vmatpush3.msra.mxu0 %v589_v9  ;;  %v1245_v59 = vld [vmem:[%s1917_s4] ss:$0 sm:$0xff]  ;;  %s1439_s17 = scalar_lea.vmem %s1160_s21, 16 }
  0x21   : > { %1312 = vmatprep.subr.mxu0 %v588_v10  ;;  %p1440_p12 = scmp.ne.s32.totalorder %s1160_s21, %s1439_s17 }
  0x22   : > { %1313 = vmatpush3.msra.mxu0 %v588_v10 }
  0x23   : > { %1314 = vmatprep.subr.mxu0 %v587_v11  ;;  %p1441_p13 = pnand %p1440_p12, %p1618_p5 }
  0x24   : > { %1315 = vmatpush3.msra.mxu0 %v587_v11 }
  0x25   : > { %1316 = vmatprep.subr.mxu0 %v586_v12  ;;  %p1442_p0 = pneg %p1441_p13 }
  0x26   : > { %1317 = vmatpush3.msra.mxu0 %v586_v12 }
  0x27   : > { %1318 = vmatprep.subr.mxu0 %v585_v13 }
  0x28   : > { %1319 = vmatpush3.msra.mxu0 %v585_v13 }
  0x29   : > { %1320 = vmatprep.subr.mxu0 %v584_v14 }
  0x2a   : > { %1321 = vmatpush3.msra.mxu0 %v584_v14 }
  0x2b   : > { %1322 = vmatprep.subr.mxu0 %v583_v17 }
  0x2c   : > { %1323 = vmatpush3.msra.mxu0 %v583_v17 }
  0x2d   : > { %1324 = vmatprep.subr.mxu0 %v582_v18 }
  0x2e   : > { %1325 = vmatpush3.msra.mxu0 %v582_v18 }
  0x2f   : > { %1326 = vmatprep.subr.mxu0 %v581_v25 }
  0x30   : > { %1327 = vmatpush3.msra.mxu0 %v581_v25  ;;  %v852_v25 = vld [vmem:[%s1920_s7 + $0x38] sm:$0xff] }
  0x31   : > { %1328 = vmatprep.subr.mxu0 %v580_v26 }
  0x32   : > { %1329 = vmatpush3.msra.mxu0 %v580_v26  ;;  %v851_v26 = vld [vmem:[%s1920_s7 + $0x30] sm:$0xff] }
  0x33   : > { %1366 = vmatprep.subr.mxu0 %v1502_v2 }
  0x96   : > { %v495_v19 = vpop.permute.xlu0 %494  ;;  %v505_v20 = vpop.permute.xlu1 %504 }
  0x97   : > { %v512_v21 = vmul.f32 %v495_v19, %v484_v15  ;;  %v514_v22 = vmul.f32 %v505_v20, %v486_v16 }
  0x99   : > { %522 = vst.msk [vmem:[#allocation2 + $0x1] sm:$0xff] %vm521_vm1, %v512_v21  ;;  %525 = vst.msk [vmem:[#allocation2 + $0x19] sm:$0xff] %vm521_vm1, %v514_v22  ;;  %v856_v21 = vld [vmem:[%s1920_s7 + $0x58] sm:$0xff]  ;;  %v855_v22 = vld [vmem:[%s1920_s7 + $0x50] sm:$0xff] }
  0x9a   : > { %v500_v27 = vpop.permute.xlu0 %499  ;;  %v510_v28 = vpop.permute.xlu1 %509  ;;  %1336 = vmatprep.subr.mxu1 %v856_v21 }
  0x9b   : > { %v513_v29 = vmul.f32 %v500_v27, %v485_v23  ;;  %v515_v30 = vmul.f32 %v510_v28, %v487_v24  ;;  %1337 = vmatpush3.msra.mxu1 %v856_v21  ;;  %v854_v23 = vld [vmem:[%s1920_s7 + $0x48] sm:$0xff]  ;;  %v853_v24 = vld [vmem:[%s1920_s7 + $0x40] sm:$0xff] }
  0x9c   : > { %1338 = vmatprep.subr.mxu1 %v855_v22  ;;  %v850_v27 = vld [vmem:[%s1920_s7 + $0x28] sm:$0xff] }
  0x9d   : > { %523 = vst.msk [vmem:[#allocation2 + $0x9] sm:$0xff] %vm521_vm1, %v513_v29  ;;  %526 = vst.msk [vmem:[#allocation2 + $0x21] sm:$0xff] %vm521_vm1, %v515_v30  ;;  %1339 = vmatpush3.msra.mxu1 %v855_v22 }
  0x9e   : > { %1340 = vmatprep.subr.mxu1 %v854_v23 }
  0x9f   : > { %1341 = vmatpush3.msra.mxu1 %v854_v23 }
  0xa0   : > { %v529_v31 = vld [vmem:[#allocation2 + $0x1] sm:$0xff]  ;;  %v556_v34 = vld [vmem:[#allocation2 + $0x19] sm:$0xff]  ;;  %1342 = vmatprep.subr.mxu1 %v853_v24 }
  0xa1   : > { %535 = vrot.lane.b32.xlu0 %v529_v31, %s1503_s25  ;;  %v527_v40 = vld [vmem:[#allocation2] sm:$0xff]  ;;  %v554_v50 = vld [vmem:[#allocation2 + $0x18] sm:$0xff]  ;;  %1343 = vmatpush3.msra.mxu1 %v853_v24 }
  0xa2   : > { %1344 = vmatprep.subr.mxu1 %v852_v25 }
  0xa3   : > { %1345 = vmatpush3.msra.mxu1 %v852_v25 }
  0xa4   : > { %v530_v32 = vld [vmem:[#allocation2 + $0x9] sm:$0xff]  ;;  %v557_v36 = vld [vmem:[#allocation2 + $0x21] sm:$0xff]  ;;  %1346 = vmatprep.subr.mxu1 %v851_v26 }
  0xa5   : > { %v531_v33 = vld [vmem:[#allocation2 + $0x2] sm:$0xff]  ;;  %537 = vrot.lane.b32.xlu1 %v530_v32, %s1503_s25  ;;  %v532_v35 = vld [vmem:[#allocation2 + $0xa] sm:$0xff]  ;;  %v558_v37 = vld [vmem:[#allocation2 + $0x1a] sm:$0xff]  ;;  %1347 = vmatpush3.msra.mxu1 %v851_v26 }
  0xa6   : > { %543 = vrot.lane.b32.xlu0 %v531_v33, %s1504_s26  ;;  %v559_v38 = vld [vmem:[#allocation2 + $0x22] sm:$0xff]  ;;  %1348 = vmatprep.subr.mxu1 %v850_v27 }
  0xa7   : > { %v528_v45 = vld [vmem:[#allocation2 + $0x8] sm:$0xff]  ;;  %v555_v55 = vld [vmem:[#allocation2 + $0x20] sm:$0xff]  ;;  %1349 = vmatpush3.msra.mxu1 %v850_v27 }
  0xa9   : > { %545 = vrot.lane.b32.xlu1 %v532_v35, %s1504_s26 }
  0xaa   : > { %562 = vrot.lane.b32.xlu0 %v556_v34, %s1503_s25 }
  0xad   : > { %564 = vrot.lane.b32.xlu1 %v557_v36, %s1503_s25 }
  0xae   : > { %570 = vrot.lane.b32.xlu0 %v558_v37, %s1504_s26 }
  0xb1   : > { %572 = vrot.lane.b32.xlu1 %v559_v38, %s1504_s26 }
 0x113   : > { %v536_v39 = vpop.permute.xlu0 %535 }
 0x114   : > { %v549_v41 = vsel %vm521_vm1, %v527_v40, %v536_v39 }
 0x117   : > { %v538_v42 = vpop.permute.xlu1 %537 }
 0x118   : > { %v544_v43 = vpop.permute.xlu0 %543  ;;  %v550_v46 = vsel %vm521_vm1, %v528_v45, %v538_v42 }
 0x119   : > { %v552_v44 = vsel %vm551_vm2, %v549_v41, %v544_v43 }
 0x11a   : > { %1330 = vmatprep.mubr.msk.f32.mxu0 %vm599_vm3, %v552_v44 }
 0x11b   : > { %v546_v47 = vpop.permute.xlu1 %545 }
 0x11c   : > { %v563_v48 = vpop.permute.xlu0 %562  ;;  %v553_v49 = vsel %vm551_vm2, %v550_v46, %v546_v47 }
 0x11d   : > { %1331 = vmatmul.mubr.msk.f32.vlgmr.msra.gmra.mxu0 %vm599_vm3, %v553_v49  ;;  %v576_v51 = vsel %vm521_vm1, %v554_v50, %v563_v48 }
 0x11f   : > { %v565_v52 = vpop.permute.xlu1 %564 }
 0x120   : > { %v571_v53 = vpop.permute.xlu0 %570  ;;  %v577_v56 = vsel %vm521_vm1, %v555_v55, %v565_v52 }
 0x121   : > { %v578_v54 = vsel %vm551_vm2, %v576_v51, %v571_v53 }
 0x122   : > { %1333 = vmatprep.mubr.msk.f32.mxu0 %vm599_vm3, %v578_v54 }
 0x123   : > { %v573_v57 = vpop.permute.xlu1 %572 }
 0x124   : > { %v579_v58 = vsel %vm551_vm2, %v577_v56, %v573_v57 }
 0x125   : > { %1334 = vmatmul.mubr.msk.f32.gmra.mxu0 %vm599_vm3, %v579_v58  ;;  %v1250_v58 = vld [vmem:[%s1918_s5] ss:$0 sm:$0xff] }
 0x126   : > { %1374 = vmatprep.mubr.msk.f32.mxu0 %vm1505_vm4, %v1502_v2 }
 0x1dd   : > { %v1332_v60 = vpop.f32.mrf.mxu0 }
 0x1de   : > { %v684_v61 = vadd.f32 %v1332_v60, %v1245_v59  ;;  %v1251_v60 = vld [vmem:[%s1919_s6] ss:$0 sm:$0xff] }
 0x1df   : > { %v678_v62 = vpop.f32.mrf.mxu0 }
 0x1e0   : > { %v1722_v63 = vmax.f32 %v684_v61, 0.0  ;;  %v679_v0 = vadd.f32 %v1245_v59, %v678_v62  ;;  %v849_v61 = vld [vmem:[%s1920_s7 + $0x20] sm:$0xff]  ;;  %v848_v62 = vld [vmem:[%s1920_s7 + $0x18] sm:$0xff] }
 0x1e1   : > { %1350 = vmatprep.subr.mxu1 %v849_v61 }
 0x1e2   : > { %v1724_v1 = vmax.f32 %v679_v0, 0.0  ;;  %v704_v3 = vsel %vm521_vm1, %v1722_v63, 0.0  ;;  %v719_v5 = vmul.f32 %v1722_v63, %v1722_v63  ;;  %1351 = vmatpush3.msra.mxu1 %v849_v61 }
 0x1e3   : > { %705 = vadd.xlane.f32.xlu1 %v704_v3  ;;  %1352 = vmatprep.subr.mxu1 %v848_v62 }
 0x1e4   : > { %v701_v4 = vsel %vm521_vm1, %v1724_v1, 0.0  ;;  %v725_v10 = vsel %vm521_vm1, %v719_v5, 0.0  ;;  %v718_v11 = vmul.f32 %v1724_v1, %v1724_v1  ;;  %1353 = vmatpush3.msra.mxu1 %v848_v62 }
 0x1e5   : > { %v1335_v6 = vpop.f32.mrf.mxu0  ;;  %702 = vadd.xlane.f32.xlu0 %v701_v4 }
 0x1e6   : > { %v694_v8 = vadd.f32 %v1335_v6, %v1245_v59  ;;  %v722_v15 = vsel %vm521_vm1, %v718_v11, 0.0  ;;  %v847_v6 = vld [vmem:[%s1920_s7 + $0x10] sm:$0xff] }
 0x1e7   : > { %v688_v7 = vpop.f32.mrf.mxu0  ;;  %1354 = vmatprep.subr.mxu1 %v847_v6 }
 0x1e8   : > { %v689_v9 = vadd.f32 %v1245_v59, %v688_v7  ;;  %v1737_v13 = vmax.f32 %v694_v8, 0.0  ;;  %v846_v7 = vld [vmem:[%s1920_s7 + $0x8] sm:$0xff]  ;;  %1355 = vmatpush3.msra.mxu1 %v847_v6 }
 0x1e9   : > { %726 = vadd.xlane.f32.xlu0 %v725_v10  ;;  %1356 = vmatprep.subr.mxu1 %v846_v7 }
 0x1ea   : > { %v1735_v12 = vmax.f32 %v689_v9, 0.0  ;;  %v710_v18 = vsel %vm521_vm1, %v1737_v13, 0.0  ;;  %v721_v19 = vmul.f32 %v1737_v13, %v1737_v13  ;;  %1357 = vmatpush3.msra.mxu1 %v846_v7 }
 0x1ec   : > { %v707_v14 = vsel %vm521_vm1, %v1735_v12, 0.0  ;;  %v720_v16 = vmul.f32 %v1735_v12, %v1735_v12  ;;  %v731_v20 = vsel %vm521_vm1, %v721_v19, 0.0 }
 0x1ed   : > { %708 = vadd.xlane.f32.xlu1 %v707_v14  ;;  %723 = vadd.xlane.f32.xlu0 %v722_v15  ;;  %v845_v14 = vld [vmem:[%s1920_s7] sm:$0xff] }
 0x1ee   : > { %v728_v17 = vsel %vm521_vm1, %v720_v16, 0.0  ;;  %1358 = vmatprep.subr.mxu1 %v845_v14 }
 0x1ef   : > { %1359 = vmatpush3.msra.mxu1 %v845_v14 }
 0x1f1   : > { %729 = vadd.xlane.f32.xlu1 %v728_v17  ;;  %711 = vadd.xlane.f32.xlu0 %v710_v18 }
 0x1f5   : > { %732 = vadd.xlane.f32.xlu0 %v731_v20 }
 0x26c   : > { %v706_v28 = vpop.xlane.xlu1 %705 }
 0x26d   : > { %v715_v30 = vmul.f32 0.03125, %v706_v28 }
 0x26e   : > { %v703_v29 = vpop.xlane.xlu0 %702 }
 0x26f   : > { %v739_v32 = vmul.f32 %v715_v30, %v715_v30  ;;  %v714_v33 = vmul.f32 0.03125, %v703_v29  ;;  %v747_v56 = vsub.f32 %v1722_v63, %v715_v30 }
 0x271   : > { %v738_v38 = vmul.f32 %v714_v33, %v714_v33  ;;  %v746_v63 = vsub.f32 %v1724_v1, %v714_v33 }
 0x272   : > { %v727_v31 = vpop.xlane.xlu0 %726 }
 0x273   : > { %v735_v34 = vmul.f32 0.03125, %v727_v31 }
 0x275   : > { %v743_v35 = vsub.f32 %v735_v34, %v739_v32 }
 0x276   : > { %v709_v36 = vpop.xlane.xlu1 %708  ;;  %v724_v37 = vpop.xlane.xlu0 %723 }
 0x277   : > { %v751_v39 = vadd.f32 1e-05, %v743_v35  ;;  %v716_v40 = vmul.f32 0.03125, %v709_v36  ;;  %v734_v41 = vmul.f32 0.03125, %v724_v37 }
 0x279   : > { %1423 = vrsqrt.f32 %v751_v39  ;;  %v742_v42 = vsub.f32 %v734_v41, %v738_v38  ;;  %v740_v45 = vmul.f32 %v716_v40, %v716_v40  ;;  %v748_v1 = vsub.f32 %v1735_v12, %v716_v40 }
 0x27a   : > { %v730_v43 = vpop.xlane.xlu1 %729  ;;  %v712_v44 = vpop.xlane.xlu0 %711 }
 0x27b   : > { %v750_v46 = vadd.f32 1e-05, %v742_v42  ;;  %v736_v47 = vmul.f32 0.03125, %v730_v43  ;;  %v717_v48 = vmul.f32 0.03125, %v712_v44 }
 0x27d   : > { %1425 = vrsqrt.f32 %v750_v46  ;;  %v744_v49 = vsub.f32 %v736_v47, %v740_v45  ;;  %v741_v52 = vmul.f32 %v717_v48, %v717_v48  ;;  %v749_v16 = vsub.f32 %v1737_v13, %v717_v48 }
 0x27e   : > { %v733_v50 = vpop.xlane.xlu0 %732 }
 0x27f   : > { %v752_v51 = vadd.f32 1e-05, %v744_v49  ;;  %v737_v53 = vmul.f32 0.03125, %v733_v50  ;;  %v1252_v50 = vld [vmem:[%s1921_s8] ss:$0 sm:$0xff] }
 0x281   : > { %1427 = vrsqrt.f32 %v752_v51  ;;  %v745_v54 = vsub.f32 %v737_v53, %v741_v52 }
 0x283   : > { %v753_v55 = vadd.f32 1e-05, %v745_v54 }
 0x285   : > { %1429 = vrsqrt.f32 %v753_v55 }
 0x286   : > { %v1424_v57 = vpop.eup %1423 }
 0x287   : > { %v759_v59 = vmul.f32 %v1424_v57, %v747_v56 }
 0x289   : > { %v770_v0 = vmul.f32 %v1250_v58, %v759_v59 }
 0x28a   : > { %v1426_v3 = vpop.eup %1425 }
 0x28b   : > { %v781_v4 = vadd.f32 %v1251_v60, %v770_v0  ;;  %v758_v5 = vmul.f32 %v1426_v3, %v746_v63 }
 0x28d   : > { %789 = vst.msk [vmem:[#allocation3 + $0x9] sm:$0xff] %vm521_vm1, %v781_v4  ;;  %v769_v8 = vmul.f32 %v1250_v58, %v758_v5 }
 0x28e   : > { %v1428_v9 = vpop.eup %1427 }
 0x28f   : > { %v780_v10 = vadd.f32 %v1251_v60, %v769_v8  ;;  %v760_v11 = vmul.f32 %v1428_v9, %v748_v1 }
 0x291   : > { %788 = vst.msk [vmem:[#allocation3 + $0x1] sm:$0xff] %vm521_vm1, %v780_v10  ;;  %v771_v15 = vmul.f32 %v1250_v58, %v760_v11  ;;  %v1048_v10 = vld [vmem:[#allocation4] sm:$0x1] }
 0x292   : > { %v1430_v17 = vpop.eup %1429 }
 0x293   : > { %v782_v12 = vadd.f32 %v1251_v60, %v771_v15  ;;  %v761_v18 = vmul.f32 %v1430_v17, %v749_v16 }
 0x294   : > { %v798_v19 = vld [vmem:[#allocation3 + $0xa] sm:$0xff] }
 0x295   : > { %v796_v20 = vld [vmem:[#allocation3 + $0x9] sm:$0xff]  ;;  %791 = vst.msk [vmem:[#allocation3 + $0x19] sm:$0xff] %vm521_vm1, %v782_v12  ;;  %v772_v21 = vmul.f32 %v1250_v58, %v761_v18  ;;  %811 = vrot.lane.b32.xlu1 %v798_v19, %s1504_s26 }
 0x296   : > { %803 = vrot.lane.b32.xlu0 %v796_v20, %s1503_s25 }
 0x297   : > { %v783_v22 = vadd.f32 %v1251_v60, %v772_v21 }
 0x298   : > { %v795_v23 = vld [vmem:[#allocation3 + $0x1] sm:$0xff] }
 0x299   : > { %792 = vst.msk [vmem:[#allocation3 + $0x21] sm:$0xff] %vm521_vm1, %v783_v22  ;;  %801 = vrot.lane.b32.xlu1 %v795_v23, %s1503_s25  ;;  %v797_v24 = vld [vmem:[#allocation3 + $0x2] sm:$0xff] }
 0x29a   : > { %v794_v31 = vld [vmem:[#allocation3 + $0x8] sm:$0xff]  ;;  %v793_v33 = vld [vmem:[#allocation3] sm:$0xff] }
 0x29c   : > { %v821_v13 = vld [vmem:[#allocation3 + $0x19] sm:$0xff] }
 0x29d   : > { %827 = vrot.lane.b32.xlu0 %v821_v13, %s1503_s25  ;;  %809 = vrot.lane.b32.xlu1 %v797_v24, %s1504_s26  ;;  %v819_v39 = vld [vmem:[#allocation3 + $0x18] sm:$0xff] }
 0x2a0   : > { %v823_v25 = vld [vmem:[#allocation3 + $0x1a] sm:$0xff]  ;;  %v824_v27 = vld [vmem:[#allocation3 + $0x22] sm:$0xff] }
 0x2a1   : > { %v822_v26 = vld [vmem:[#allocation3 + $0x21] sm:$0xff]  ;;  %835 = vrot.lane.b32.xlu0 %v823_v25, %s1504_s26 }
 0x2a2   : > { %829 = vrot.lane.b32.xlu1 %v822_v26, %s1503_s25  ;;  %v820_v44 = vld [vmem:[#allocation3 + $0x20] sm:$0xff] }
 0x2a6   : > { %837 = vrot.lane.b32.xlu1 %v824_v27, %s1504_s26  ;;  %s483_s26 = scalar_lea.vmem %s1915_s2, %s482_s14  ;;  %s1506_s14 = smov [#allocation5]  }
 0x2a7   : > { %s1443_s12 = sshll.u32 %s1506_s14, 4  ;;  %s1444_s12 = int_to_ptr.vmem [resolvable:$false] %s1443_s12 }
 0x2a8   : > { %s1445_s25 = scalar_lea.vmem %s1444_s12, 32  ;;  %p1446_p1 = scmp.lt.s32.totalorder %s1160_s21, %s1444_s12 }
 0x2a9   : > { %p1447_p2 = scmp.lt.s32.totalorder %s1445_s25, %s1439_s17 }
 0x2ab   : > { %p1448_p3 = por %p1447_p2, %p1446_p1 }
 0x2ad   : > { %p1449_p4 = pnand %p1448_p3, %p1442_p0 }
 0x307   : > { %v812_v28 = vpop.permute.xlu1 %811 }
 0x308   : > { %v804_v29 = vpop.permute.xlu0 %803 }
 0x309   : > { %v816_v32 = vsel %vm521_vm1, %v794_v31, %v804_v29 }
 0x30a   : > { %v818_v38 = vsel %vm551_vm2, %v816_v32, %v812_v28 }
 0x30b   : > { %v802_v30 = vpop.permute.xlu1 %801 }
 0x30c   : > { %v815_v34 = vsel %vm521_vm1, %v793_v33, %v802_v30 }
 0x30f   : > { %v810_v35 = vpop.permute.xlu1 %809  ;;  %v828_v36 = vpop.permute.xlu0 %827 }
 0x310   : > { %v817_v37 = vsel %vm551_vm2, %v815_v34, %v810_v35  ;;  %v841_v40 = vsel %vm521_vm1, %v819_v39, %v828_v36 }
 0x311   : > { %1360 = vmatprep.mubr.msk.f32.mxu1 %vm599_vm3, %v817_v37 }
 0x312   : > { %1361 = vmatmul.mubr.msk.f32.vlgmr.msra.gmra.mxu1 %vm599_vm3, %v818_v38 }
 0x313   : > { %v836_v42 = vpop.permute.xlu0 %835 }
 0x314   : > { %v830_v41 = vpop.permute.xlu1 %829  ;;  %v843_v43 = vsel %vm551_vm2, %v841_v40, %v836_v42 }
 0x315   : > { %1363 = vmatprep.mubr.msk.f32.mxu1 %vm599_vm3, %v843_v43  ;;  %v842_v45 = vsel %vm521_vm1, %v820_v44, %v830_v41  ;;  %v1257_v41 = vld [vmem:[%s1922_s9] ss:$0 sm:$0xff] }
 0x316   : > { %v1258_v43 = vld [vmem:[%s1923_s10] ss:$0 sm:$0xff] }
 0x318   : > { %v838_v46 = vpop.permute.xlu1 %837 }
 0x319   : > { %v844_v47 = vsel %vm551_vm2, %v842_v45, %v838_v46 }
 0x31a   : > { %1364 = vmatmul.mubr.msk.f32.gmra.mxu1 %vm599_vm3, %v844_v47 }
 0x3d2   : > { %v1362_v48 = vpop.f32.mrf.mxu1 }
 0x3d3   : > { %v948_v54 = vadd.f32 %v1362_v48, %v1252_v50 }
 0x3d4   : > { %v942_v49 = vpop.f32.mrf.mxu1 }
 0x3d5   : > { %v1831_v60 = vmax.f32 %v948_v54, 0.0  ;;  %v943_v61 = vadd.f32 %v1252_v50, %v942_v49 }
 0x3d7   : > { %v1838_v3 = vmax.f32 %v943_v61, 0.0  ;;  %v968_v4 = vsel %vm521_vm1, %v1831_v60, 0.0  ;;  %v982_v6 = vmul.f32 %v1831_v60, %v1831_v60  ;;  %v1047_v61 = vld [vmem:[%s1924_s11] sm:$0x1] }
 0x3d9   : > { %v965_v7 = vsel %vm521_vm1, %v1838_v3, 0.0  ;;  %v988_v1 = vsel %vm521_vm1, %v982_v6, 0.0  ;;  %v981_v8 = vmul.f32 %v1838_v3, %v1838_v3 }
 0x3da   : > { %v1365_v51 = vpop.f32.mrf.mxu1 }
 0x3db   : > { %v958_v52 = vadd.f32 %v1365_v51, %v1252_v50  ;;  %v985_v9 = vsel %vm521_vm1, %v981_v8, 0.0 }
 0x3dc   : > { %v952_v53 = vpop.f32.mrf.mxu1 }
 0x3dd   : > { %v1823_v55 = vmax.f32 %v958_v52, 0.0  ;;  %v953_v56 = vadd.f32 %v1252_v50, %v952_v53 }
 0x3df   : > { %v1825_v57 = vmax.f32 %v953_v56, 0.0  ;;  %v974_v58 = vsel %vm521_vm1, %v1823_v55, 0.0  ;;  %v984_v59 = vmul.f32 %v1823_v55, %v1823_v55 }
 0x3e0   : > { %975 = vadd.xlane.f32.xlu0 %v974_v58 }
 0x3e1   : > { %v994_v62 = vsel %vm521_vm1, %v984_v59, 0.0  ;;  %v971_v63 = vsel %vm521_vm1, %v1825_v57, 0.0  ;;  %v983_v0 = vmul.f32 %v1825_v57, %v1825_v57 }
 0x3e2   : > { %995 = vadd.xlane.f32.xlu1 %v994_v62  ;;  %v1054_v62 = vlaneseq }
 0x3e3   : > { %v991_v5 = vsel %vm521_vm1, %v983_v0, 0.0 }
 0x3e4   : > { %972 = vadd.xlane.f32.xlu0 %v971_v63  ;;  %v1055_v63 = vshrl.u32 %v1054_v62, 7 }
 0x3e6   : > { %969 = vadd.xlane.f32.xlu1 %v968_v4  ;;  %v1056_v0 = vsub.s32 0, %v1055_v63 }
 0x3e8   : > { %992 = vadd.xlane.f32.xlu0 %v991_v5  ;;  %v1143_v5 = vld [vmem:[%s483_s26] sm:$0x1] }
 0x3ea   : > { %966 = vadd.xlane.f32.xlu1 %v965_v7 }
 0x3ec   : > { %989 = vadd.xlane.f32.xlu0 %v988_v1 }
 0x3f0   : > { %986 = vadd.xlane.f32.xlu0 %v985_v9 }
 0x3fb   : > { %1051 = vperm.xlu1 %1422, %v1048_v10  }
 0x469   : > { %v976_v11 = vpop.xlane.xlu0 %975 }
 0x46a   : > { %v980_v14 = vmul.f32 0.03125, %v976_v11 }
 0x46b   : > { %v996_v15 = vpop.xlane.xlu1 %995 }
 0x46c   : > { %v1004_v16 = vmul.f32 %v980_v14, %v980_v14  ;;  %v1000_v17 = vmul.f32 0.03125, %v996_v15  ;;  %v1012_v38 = vsub.f32 %v1823_v55, %v980_v14 }
 0x46d   : > { %v973_v12 = vpop.xlane.xlu0 %972 }
 0x46e   : > { %v1008_v18 = vsub.f32 %v1000_v17, %v1004_v16  ;;  %v979_v19 = vmul.f32 0.03125, %v973_v12 }
 0x46f   : > { %v970_v20 = vpop.xlane.xlu1 %969 }
 0x470   : > { %v1016_v21 = vadd.f32 1e-05, %v1008_v18  ;;  %v1003_v23 = vmul.f32 %v979_v19, %v979_v19  ;;  %v978_v13 = vmul.f32 0.03125, %v970_v20  ;;  %v1011_v45 = vsub.f32 %v1825_v57, %v979_v19 }
 0x471   : > { %v993_v22 = vpop.xlane.xlu0 %992 }
 0x472   : > { %1431 = vrsqrt.f32 %v1016_v21  ;;  %v999_v24 = vmul.f32 0.03125, %v993_v22  ;;  %v1002_v28 = vmul.f32 %v978_v13, %v978_v13  ;;  %v1010_v49 = vsub.f32 %v1831_v60, %v978_v13 }
 0x473   : > { %v967_v25 = vpop.xlane.xlu1 %966 }
 0x474   : > { %v1007_v26 = vsub.f32 %v999_v24, %v1003_v23  ;;  %v977_v30 = vmul.f32 0.03125, %v967_v25 }
 0x475   : > { %v990_v27 = vpop.xlane.xlu0 %989 }
 0x476   : > { %v1015_v29 = vadd.f32 1e-05, %v1007_v26  ;;  %v998_v31 = vmul.f32 0.03125, %v990_v27  ;;  %v1001_v34 = vmul.f32 %v977_v30, %v977_v30  ;;  %v1009_v54 = vsub.f32 %v1838_v3, %v977_v30 }
 0x477   : > { %v1052_v3 = vpop.permute.xlu1 %1051 }
 0x478   : > { %1433 = vrsqrt.f32 %v1015_v29  ;;  %v1006_v32 = vsub.f32 %v998_v31, %v1002_v28 }
 0x479   : > { %v987_v33 = vpop.xlane.xlu0 %986 }
 0x47a   : > { %v1014_v35 = vadd.f32 1e-05, %v1006_v32  ;;  %v997_v36 = vmul.f32 0.03125, %v987_v33 }
 0x47c   : > { %1435 = vrsqrt.f32 %v1014_v35  ;;  %v1005_v37 = vsub.f32 %v997_v36, %v1001_v34 }
 0x47e   : > { %v1013_v39 = vadd.f32 1e-05, %v1005_v37 }
 0x47f   : > { %v1432_v40 = vpop.eup %1431 }
 0x480   : > { %1437 = vrsqrt.f32 %v1013_v39  ;;  %v1024_v42 = vmul.f32 %v1432_v40, %v1012_v38 }
 0x482   : > { %v1035_v44 = vmul.f32 %v1257_v41, %v1024_v42 }
 0x484   : > { %v1046_v46 = vadd.f32 %v1258_v43, %v1035_v44 }
 0x485   : > { %v1434_v47 = vpop.eup %1433 }
 0x486   : > { %1367 = vmatpush3.xpose.msk.msra.mxu0 %vm521_vm1, %v1046_v46  ;;  %v1023_v48 = vmul.f32 %v1434_v47, %v1011_v45 }
 0x487   : > { %1368 = vmatprep.subr.mxu0 %v1502_v2 }
 0x488   : > { %v1034_v50 = vmul.f32 %v1257_v41, %v1023_v48 }
 0x489   : > { %v1436_v51 = vpop.eup %1435 }
 0x48a   : > { %v1045_v52 = vadd.f32 %v1258_v43, %v1034_v50  ;;  %v1022_v53 = vmul.f32 %v1436_v51, %v1010_v49 }
 0x48c   : > { %1369 = vmatpush3.xpose.msk.msra.mxu0 %vm521_vm1, %v1045_v52  ;;  %v1033_v55 = vmul.f32 %v1257_v41, %v1022_v53 }
 0x48d   : > { %v1438_v56 = vpop.eup %1437  ;;  %1370 = vmatprep.subr.mxu0 %v1502_v2 }
 0x48e   : > { %v1044_v57 = vadd.f32 %v1258_v43, %v1033_v55  ;;  %v1021_v58 = vmul.f32 %v1438_v56, %v1009_v54 }
 0x490   : > { %1371 = vmatpush3.xpose.msk.msra.mxu0 %vm521_vm1, %v1044_v57  ;;  %v1032_v59 = vmul.f32 %v1257_v41, %v1021_v58 }
 0x491   : > { %1372 = vmatprep.subr.mxu0 %v1502_v2  ;;  %v1057_v2 = vrot.slane %v1052_v3, %v1056_v0 }
 0x492   : > { %v1043_v60 = vadd.f32 %v1258_v43, %v1032_v59 }
 0x494   : > { %1373 = vmatpush3.xpose.msk.msra.mxu0 %vm521_vm1, %v1043_v60 }
 0x497   : > { %1375 = vmatmul.mubr.msk.f32.vlgmr.msra.gmra.mxu0 %vm521_vm1, %v1047_v61 }
 0x557   : > { %v1139_v4 = vpop.f32.mrf.mxu0 }
 0x558   : > { %v1140_v6 = vadd.f32 %v1139_v4, %v1057_v2 }
 0x559   : > { %v1376_v7 = vpop.f32.mrf.mxu0 }
 0x55a   : > { %v1144_v1 = vmul.f32 %v1143_v5, %v1140_v6 }
 0x55c   : > { %1145 = vst.msk [vmem:[%s466_s24] sm:$0x1] %vm516_vm0, %v1144_v1 }
 0x55d   : > { %1452 = shalt.err (!%p1449_p4)
}
 0x55e   : > { %s1453_s26 = scalar_lea.hbm %s1157_s18, 16  ;;  %s1457_s24 = scalar_lea.hbm %s1926_s13, 32 }
 0x55f   : > { %p1454_p7 = scmp.ne.s32.totalorder %s1157_s18, %s1453_s26  ;;  %p1458_p10 = scmp.lt.s32.totalorder %s1157_s18, %s1926_s13 }
 0x560   : > { %p1459_p11 = scmp.lt.s32.totalorder %s1457_s24, %s1453_s26 }
 0x561   : > { %p1455_p8 = pnand %p1454_p7, %p1618_p5 }
 0x562   : > { %p1460_p12 = por %p1459_p11, %p1458_p10 }
 0x563   : > { %p1456_p9 = pneg %p1455_p8 }
 0x565   : > { %p1461_p13 = pnand %p1460_p12, %p1456_p9 }
 0x567   : > { %1464 = shalt.err (!%p1461_p13)
}
 0x568   : > { %1377 = dma.vmem_to_hbm [thread:$0]  (%p1618_p5), %s1160_s21, 16, %s1157_s18, %s1147_s0  }
 0x569 PF: > { %p1383_p0 = scmp.ge.s32.totalorder %s1499_s30, 2  ;;  %s1171_s17 = sand.u32 1, %s1487_s27  }
 0x56a   : > { %s1172_s14 = scalar_lea.sflag [#allocation6], %s1171_s17 }
 0x56b   : > { %p1380_p1 = pnand %p1383_p0, %p1622_p6 }
 0x56d   : > { %p1381_p2 = pneg %p1380_p1 }
 0x56f   : > { %1482 = dma.done.wait (%p1381_p2), %s1172_s14, 16  }
 0x570   : > { %1484 = vsyncadd (%p1381_p2), %s1172_s14, 4294967280  ;;  %s1936_s12 = sld [smem:[#allocation8_spill]]  ;;  %p25_p3 = scmp.ge.s32.totalorder %s1605_s15, 4  }
 0x571   : > { %s1937_s27 = smov %s1491_s28  ;;  %s1938_s28 = smov %s1495_s29 }
 0x572   : > { %s1940_s30 = smov %s1605_s15  ;;  %27 = sbr.rel (!%p25_p3) target bundleno = 6 (0x6), region = 115 }
 0x576   : > { %s1939_s29 = smov %s1936_s12 }
 0x577   :  { %1176 = vsyncpa [#allocation6], 1 }
 0x578   :  { %1178 = vsyncpa [#allocation6 + $0x1], 1 }

</bundles_post_ra>
